<compile_context>
chip_gen: v5e
topology: v5e:2x2
jax: 0.10.0
libtpu: 0.0.40
codegen_flags: <defaults>
</compile_context>

<pallas_src>
import functools

import jax
import jax.numpy as jnp
import numpy as np
from jax.experimental import pallas as pl
from jax.experimental.pallas import tpu as pltpu

_EPS = 1e-5


# --------------------------------------------------------------------------
# In-kernel helpers (operate on lane-dense (C, H*W) tiles)
# --------------------------------------------------------------------------
def _shift_flat(x, d):
    """z[:, p] = x[:, p + d], zero-filled outside [0, H*W). `d` is static."""
    if d == 0:
        return x
    c, hw = x.shape
    zeros = jnp.zeros((c, abs(d)), x.dtype)
    if d > 0:
        return jnp.concatenate([x[:, d:], zeros], axis=1)
    return jnp.concatenate([zeros, x[:, :hw + d]], axis=1)


def _conv3x3_flat(x, h, w, w_mat):
    """3x3 / padding=1 / stride=1 conv on a flattened-spatial tile.

    x:     (C, h*w)     activations, row-major flattened spatial
    w_mat: (Cout, 9*C)  weights, tap-major ((kh*3+kw)*C + ci)
    returns (Cout, h*w) float32
    """
    c, hw = x.shape
    col = jax.lax.broadcasted_iota(jnp.int32, (c, hw), 1) % w
    taps = []
    for kh in range(3):
        dy = kh - 1
        for kw in range(3):
            dx = kw - 1
            t = _shift_flat(x, dy * w + dx)
            # Mask columns where the horizontal tap crosses a row boundary
            # (vertical out-of-range taps are already zero-filled by the shift).
            if dx == -1:
                t = jnp.where(col >= 1, t, 0.0)
            elif dx == 1:
                t = jnp.where(col <= w - 2, t, 0.0)
            taps.append(t)
    patches = jnp.concatenate(taps, axis=0)                  # (9*C, h*w)
    return jnp.dot(w_mat, patches, preferred_element_type=jnp.float32)


def _channel_stats(y):
    """Per-channel [sum, sum-of-squares] of a (C, L) tile -> (C, 2)."""
    return jnp.concatenate(
        [jnp.sum(y, axis=1, keepdims=True),
         jnp.sum(y * y, axis=1, keepdims=True)], axis=1)


# --------------------------------------------------------------------------
# Pallas kernels
# --------------------------------------------------------------------------
def _make_stage1_kernel(h, w, stride, has_downsample):
    """conv1 (3x3, stride) [+ downsample conv1x1 (stride)] + partial BN stats."""

    def kernel(*refs):
        it = iter(refs)
        x_ref = next(it)
        w1_ref = next(it)
        wd_ref = next(it) if has_downsample else None
        sel_ref = next(it) if stride != 1 else None
        y1_ref = next(it)
        st1_ref = next(it)
        yd_ref = next(it) if has_downsample else None
        std_ref = next(it) if has_downsample else None

        x = x_ref[0]                                         # (Cpad, h*w)
        y1 = _conv3x3_flat(x, h, w, w1_ref[...])             # (Cout, h*w)
        if sel_ref is not None:                              # fold the stride
            y1 = jnp.dot(y1, sel_ref[...], preferred_element_type=jnp.float32)
        y1_ref[0] = y1
        st1_ref[0] = _channel_stats(y1)

        if has_downsample:
            yd = jnp.dot(wd_ref[...], x, preferred_element_type=jnp.float32)
            if sel_ref is not None:
                yd = jnp.dot(yd, sel_ref[...], preferred_element_type=jnp.float32)
            yd_ref[0] = yd
            std_ref[0] = _channel_stats(yd)

    return kernel


def _make_stage2_kernel(h, w):
    """Folded BN1 + ReLU + conv2 (3x3, stride 1) + partial BN2 stats."""

    def kernel(y1_ref, s1_ref, b1_ref, w2_ref, y2_ref, st2_ref):
        a = jnp.maximum(y1_ref[0] * s1_ref[...] + b1_ref[...], 0.0)
        y2 = _conv3x3_flat(a, h, w, w2_ref[...])
        y2_ref[0] = y2
        st2_ref[0] = _channel_stats(y2)

    return kernel


def _stage3_kernel(y2_ref, s2_ref, b2_ref, r_ref, sr_ref, br_ref, o_ref):
    """Folded BN2 + folded downsample-BN (or identity) + residual add + ReLU."""
    o_ref[0] = jnp.maximum(
        y2_ref[0] * s2_ref[...] + b2_ref[...]
        + r_ref[0] * sr_ref[...] + br_ref[...], 0.0)


# --------------------------------------------------------------------------
# Wrapper-side glue (tiny XLA ops on (N,C,2)/(C,) tensors only)
# --------------------------------------------------------------------------
def _bn_fold(stats, gamma, beta, count):
    """Fold batch-stat BN into per-channel scale/bias: y*scale + bias."""
    # TODO(synk): running_mean/running_var buffer updates (PyTorch training-mode
    # module state) are not emitted; the forward output does not depend on them.
    s = jnp.sum(stats, axis=0)                        # (C, 2)
    mean = s[:, 0] / count
    var = s[:, 1] / count - mean * mean               # single-pass variance
    scale = gamma * jax.lax.rsqrt(var + _EPS)
    bias = beta - mean * scale
    return scale.reshape(-1, 1), bias.reshape(-1, 1)


def _weight_to_tap_major(w, cpad):
    """(3, 3, Cin, Cout) HWIO -> (Cout, 9*cpad), tap-major, Cin zero-padded."""
    _, _, cin, cout = w.shape
    wt = jnp.transpose(w, (3, 0, 1, 2))               # (Cout, 3, 3, Cin)
    wt = jnp.pad(wt, ((0, 0), (0, 0), (0, 0), (0, cpad - cin)))
    return wt.reshape(cout, 9 * cpad)


@functools.partial(jax.jit, static_argnames=("stride",))
def basic_block_forward(x_nchw, params, stride):
    n, cin, h, w = x_nchw.shape
    cout = params["w1"].shape[-1]
    ho = (h - 1) // stride + 1
    wo = (w - 1) // stride + 1
    hw, howo = h * w, ho * wo
    has_downsample = (stride != 1) or (cin != cout)

    # Pad channels to a sublane multiple so the in-kernel im2col stays
    # 8-aligned (a no-op for standard ResNet channel counts >= 8).
    cpad = -(-cin // 8) * 8
    x_flat = x_nchw.reshape(n, cin, hw)               # free: NCHW is contiguous
    if cpad != cin:
        x_flat = jnp.pad(x_flat, ((0, 0), (0, cpad - cin), (0, 0)))

    w1_mat = _weight_to_tap_major(params["w1"], cpad)          # (cout, 9*cpad)
    w2_mat = _weight_to_tap_major(params["w2"], cout)          # (cout, 9*cout)

    vec_spec_in = pl.BlockSpec((1, cpad, hw), lambda i: (i, 0, 0))
    vec_spec_out = pl.BlockSpec((1, cout, howo), lambda i: (i, 0, 0))
    st_spec = pl.BlockSpec((1, cout, 2), lambda i: (i, 0, 0))
    sb_spec = pl.BlockSpec((cout, 1), lambda i: (0, 0))
    cparams = pltpu.CompilerParams(dimension_semantics=("parallel",))

    # ---- stage 1: conv1 (+ downsample conv1x1) + partial BN stats -----------
    in_arrays = [x_flat, w1_mat]
    in_specs = [vec_spec_in, pl.BlockSpec((cout, 9 * cpad), lambda i: (0, 0))]
    if has_downsample:
        wd_mat = jnp.pad(params["wd"].T, ((0, 0), (0, cpad - cin)))  # (cout, cpad)
        in_arrays.append(wd_mat)
        in_specs.append(pl.BlockSpec((cout, cpad), lambda i: (0, 0)))
    if stride != 1:
        sel = np.zeros((hw, howo), np.float32)        # stride-decimation selector
        for oi in range(ho):
            for oj in range(wo):
                sel[(oi * stride) * w + oj * stride, oi * wo + oj] = 1.0
        in_arrays.append(jnp.asarray(sel))
        in_specs.append(pl.BlockSpec((hw, howo), lambda i: (0, 0)))

    out_shapes = [jax.ShapeDtypeStruct((n, cout, howo), jnp.float32),
                  jax.ShapeDtypeStruct((n, cout, 2), jnp.float32)]
    out_specs = [vec_spec_out, st_spec]
    if has_downsample:
        out_shapes += [jax.ShapeDtypeStruct((n, cout, howo), jnp.float32),
                       jax.ShapeDtypeStruct((n, cout, 2), jnp.float32)]
        out_specs += [vec_spec_out, st_spec]

    stage1 = pl.pallas_call(
        _make_stage1_kernel(h, w, stride, has_downsample),
        out_shape=tuple(out_shapes),
        grid=(n,),
        in_specs=in_specs,
        out_specs=tuple(out_specs),
        compiler_params=cparams,
    )(*in_arrays)
    if has_downsample:
        y1, st1, yd, std = stage1
    else:
        (y1, st1), yd, std = stage1, None, None

    cnt = float(n * howo)
    scale1, bias1 = _bn_fold(st1, params["g1"], params["b1"], cnt)

    # ---- stage 2: folded BN1 + ReLU + conv2 + partial BN2 stats --------------
    y2, st2 = pl.pallas_call(
        _make_stage2_kernel(ho, wo),
        out_shape=(jax.ShapeDtypeStruct((n, cout, howo), jnp.float32),
                   jax.ShapeDtypeStruct((n, cout, 2), jnp.float32)),
        grid=(n,),
        in_specs=[vec_spec_out, sb_spec, sb_spec,
                  pl.BlockSpec((cout, 9 * cout), lambda i: (0, 0))],
        out_specs=(vec_spec_out, st_spec),
        compiler_params=cparams,
    )(y1, scale1, bias1, w2_mat)

    scale2, bias2 = _bn_fold(st2, params["g2"], params["b2"], cnt)

    # ---- stage 3: folded BN2 + (folded BN_ds | identity) + residual + ReLU ---
    if has_downsample:
        scale_r, bias_r = _bn_fold(std, params["gd"], params["bd"], cnt)
        resid = yd
    else:
        resid = x_flat[:, :cout, :]   # identity path (cin == cout, stride == 1)
        scale_r = jnp.ones((cout, 1), jnp.float32)
        bias_r = jnp.zeros((cout, 1), jnp.float32)

    out = pl.pallas_call(
        _stage3_kernel,
        out_shape=jax.ShapeDtypeStruct((n, cout, howo), jnp.float32),
        grid=(n,),
        in_specs=[vec_spec_out, sb_spec, sb_spec, vec_spec_out, sb_spec, sb_spec],
        out_specs=vec_spec_out,
        compiler_params=cparams,
    )(y2, scale2, bias2, resid, scale_r, bias_r)

    return out.reshape(n, cout, ho, wo)               # NCHW, free reshape


# --------------------------------------------------------------------------
# Pure-JAX reference (sanity checking only)
# --------------------------------------------------------------------------
def _ref_conv(x, w, stride, padding):
    return jax.lax.conv_general_dilated(
        x, w, window_strides=(stride, stride), padding=padding,
        dimension_numbers=("NHWC", "HWIO", "NHWC"),
        precision=jax.lax.Precision.HIGHEST)


def _ref_bn(x, g, b):
    mean = jnp.mean(x, axis=(0, 1, 2), keepdims=True)
    var = jnp.mean((x - mean) ** 2, axis=(0, 1, 2), keepdims=True)
    return (x - mean) * jax.lax.rsqrt(var + _EPS) * g + b


def _ref_block(x_nchw, params, stride):
    x = jnp.transpose(x_nchw, (0, 2, 3, 1))
    r = _ref_conv(x, params["w1"], stride, ((1, 1), (1, 1)))
    r = jnp.maximum(_ref_bn(r, params["g1"], params["b1"]), 0.0)
    r = _ref_conv(r, params["w2"], 1, ((1, 1), (1, 1)))
    r = _ref_bn(r, params["g2"], params["b2"])
    cin, cout = params["wd"].shape
    d = _ref_conv(x, params["wd"].reshape(1, 1, cin, cout), stride, "VALID")
    d = _ref_bn(d, params["gd"], params["bd"])
    r = jnp.maximum(r + d, 0.0)
    return jnp.transpose(r, (0, 3, 1, 2))


# --------------------------------------------------------------------------
if __name__ == "__main__":
    N, Cin, H, W = 2, 4, 16, 16
    Cout, stride = 8, 2  # stride != 1 and Cin != Cout -> downsample path active

    key = jax.random.PRNGKey(0)
    keys = jax.random.split(key, 10)
    params = dict(
        w1=0.1 * jax.random.normal(keys[0], (3, 3, Cin, Cout), jnp.float32),
        g1=1.0 + 0.1 * jax.random.normal(keys[1], (Cout,), jnp.float32),
        b1=0.1 * jax.random.normal(keys[2], (Cout,), jnp.float32),
        w2=0.1 * jax.random.normal(keys[3], (3, 3, Cout, Cout), jnp.float32),
        g2=1.0 + 0.1 * jax.random.normal(keys[4], (Cout,), jnp.float32),
        b2=0.1 * jax.random.normal(keys[5], (Cout,), jnp.float32),
        wd=0.1 * jax.random.normal(keys[6], (Cin, Cout), jnp.float32),
        gd=1.0 + 0.1 * jax.random.normal(keys[7], (Cout,), jnp.float32),
        bd=0.1 * jax.random.normal(keys[8], (Cout,), jnp.float32),
    )
    x = jax.random.normal(keys[9], (N, Cin, H, W), jnp.float32)

    out = jax.block_until_ready(basic_block_forward(x, params, stride))
    ref = jax.block_until_ready(_ref_block(x, params, stride))
    np.testing.assert_allclose(np.asarray(out), np.asarray(ref),
                               rtol=1e-4, atol=1e-4)
    assert out.shape == (N, Cout, H // stride, W // stride)
    print("KERNEL_OK")
</pallas_src>

<mosaic_0001>
module attributes {stable_mosaic.version = 11 : i64} {
  func.func @kernel(%arg0: i32, %arg1: memref<1x8x256xf32, #tpu.memory_space<vmem>>, %arg2: memref<8x72xf32, #tpu.memory_space<vmem>>, %arg3: memref<8x8xf32, #tpu.memory_space<vmem>>, %arg4: memref<256x64xf32, #tpu.memory_space<vmem>>, %arg5: memref<1x8x64xf32, #tpu.memory_space<vmem>>, %arg6: memref<1x8x2xf32, #tpu.memory_space<vmem>>, %arg7: memref<1x8x64xf32, #tpu.memory_space<vmem>>, %arg8: memref<1x8x2xf32, #tpu.memory_space<vmem>>) attributes {dimension_semantics = [#tpu.dimension_semantics<parallel>], iteration_bounds = array<i64: 2>, scalar_prefetch = 0 : i64, scratch_operands = 0 : i64, tpu.core_type = #tpu.core_type<tc>, window_params = [{transform_indices = @transform_0, window_bounds = array<i64: 1, 8, 256>}, {pipeline_mode = #tpu.pipeline_mode<synchronous>, transform_indices = @transform_1, window_bounds = array<i64: 8, 72>}, {pipeline_mode = #tpu.pipeline_mode<synchronous>, transform_indices = @transform_2, window_bounds = array<i64: 8, 8>}, {pipeline_mode = #tpu.pipeline_mode<synchronous>, transform_indices = @transform_3, window_bounds = array<i64: 256, 64>}, {transform_indices = @transform_4, window_bounds = array<i64: 1, 8, 64>}, {transform_indices = @transform_5, window_bounds = array<i64: 1, 8, 2>}, {transform_indices = @transform_6, window_bounds = array<i64: 1, 8, 64>}, {transform_indices = @transform_7, window_bounds = array<i64: 1, 8, 2>}]} {
    %c0 = arith.constant 0 : index
    %c0_0 = arith.constant 0 : index
    %c0_1 = arith.constant 0 : index
    %0 = vector.load %arg1[%c0, %c0_0, %c0_1] : memref<1x8x256xf32, #tpu.memory_space<vmem>>, vector<1x8x256xf32>
    %1 = vector.shape_cast %0 : vector<1x8x256xf32> to vector<8x256xf32>
    %c0_2 = arith.constant 0 : index
    %c0_3 = arith.constant 0 : index
    %2 = vector.load %arg2[%c0_2, %c0_3] : memref<8x72xf32, #tpu.memory_space<vmem>>, vector<8x72xf32>
    %3 = tpu.iota {dimensions = array<i32: 1>} : vector<8x256xi32>
    %c16_i32 = arith.constant 16 : i32
    %c0_i32 = arith.constant 0 : i32
    %4 = arith.cmpi eq, %c16_i32, %c0_i32 : i32
    %c1_i32 = arith.constant 1 : i32
    %5 = arith.select %4, %c1_i32, %c16_i32 : i32
    %6 = vector.broadcast %5 : i32 to vector<8x256xi32>
    %7 = arith.remsi %3, %6 : vector<8x256xi32>
    %c0_i32_4 = arith.constant 0 : i32
    %8 = vector.broadcast %c0_i32_4 : i32 to vector<8x256xi32>
    %9 = arith.cmpi ne, %7, %8 : vector<8x256xi32>
    %c0_i32_5 = arith.constant 0 : i32
    %10 = vector.broadcast %c0_i32_5 : i32 to vector<8x256xi32>
    %11 = arith.cmpi slt, %7, %10 : vector<8x256xi32>
    %c0_i32_6 = arith.constant 0 : i32
    %12 = arith.cmpi slt, %5, %c0_i32_6 : i32
    %13 = vector.broadcast %12 : i1 to vector<8x256xi1>
    %14 = vector.broadcast %13 : vector<8x256xi1> to vector<8x256xi1>
    %15 = arith.xori %11, %14 : vector<8x256xi1>
    %16 = arith.andi %15, %9 : vector<8x256xi1>
    %17 = vector.broadcast %5 : i32 to vector<8x256xi32>
    %18 = arith.addi %7, %17 : vector<8x256xi32>
    %19 = arith.select %16, %18, %7 : vector<8x256xi1>, vector<8x256xi32>
    %cst = arith.constant 0.000000e+00 : f32
    %20 = vector.broadcast %cst : f32 to vector<8x17xf32>
    %21 = vector.extract_strided_slice %1 {offsets = [0, 0], sizes = [8, 239], strides = [1, 1]} : vector<8x256xf32> to vector<8x239xf32>
    %22 = tpu.concatenate %20, %21 in 1 : vector<8x17xf32>, vector<8x239xf32> -> vector<8x256xf32>
    %c1_i32_7 = arith.constant 1 : i32
    %23 = vector.broadcast %c1_i32_7 : i32 to vector<8x256xi32>
    %24 = arith.cmpi sge, %19, %23 : vector<8x256xi32>
    %cst_8 = arith.constant 0.000000e+00 : f32
    %25 = vector.broadcast %cst_8 : f32 to vector<8x256xf32>
    %26 = arith.select %24, %22, %25 : vector<8x256xi1>, vector<8x256xf32>
    %cst_9 = arith.constant 0.000000e+00 : f32
    %27 = vector.broadcast %cst_9 : f32 to vector<8x16xf32>
    %28 = vector.extract_strided_slice %1 {offsets = [0, 0], sizes = [8, 240], strides = [1, 1]} : vector<8x256xf32> to vector<8x240xf32>
    %29 = tpu.concatenate %27, %28 in 1 : vector<8x16xf32>, vector<8x240xf32> -> vector<8x256xf32>
    %cst_10 = arith.constant 0.000000e+00 : f32
    %30 = vector.broadcast %cst_10 : f32 to vector<8x15xf32>
    %31 = vector.extract_strided_slice %1 {offsets = [0, 0], sizes = [8, 241], strides = [1, 1]} : vector<8x256xf32> to vector<8x241xf32>
    %32 = tpu.concatenate %30, %31 in 1 : vector<8x15xf32>, vector<8x241xf32> -> vector<8x256xf32>
    %c14_i32 = arith.constant 14 : i32
    %33 = vector.broadcast %c14_i32 : i32 to vector<8x256xi32>
    %34 = arith.cmpi sle, %19, %33 : vector<8x256xi32>
    %cst_11 = arith.constant 0.000000e+00 : f32
    %35 = vector.broadcast %cst_11 : f32 to vector<8x256xf32>
    %36 = arith.select %34, %32, %35 : vector<8x256xi1>, vector<8x256xf32>
    %cst_12 = arith.constant 0.000000e+00 : f32
    %37 = vector.broadcast %cst_12 : f32 to vector<8x1xf32>
    %38 = vector.extract_strided_slice %1 {offsets = [0, 0], sizes = [8, 255], strides = [1, 1]} : vector<8x256xf32> to vector<8x255xf32>
    %39 = tpu.concatenate %37, %38 in 1 : vector<8x1xf32>, vector<8x255xf32> -> vector<8x256xf32>
    %c1_i32_13 = arith.constant 1 : i32
    %40 = vector.broadcast %c1_i32_13 : i32 to vector<8x256xi32>
    %41 = arith.cmpi sge, %19, %40 : vector<8x256xi32>
    %cst_14 = arith.constant 0.000000e+00 : f32
    %42 = vector.broadcast %cst_14 : f32 to vector<8x256xf32>
    %43 = arith.select %41, %39, %42 : vector<8x256xi1>, vector<8x256xf32>
    %cst_15 = arith.constant 0.000000e+00 : f32
    %44 = vector.broadcast %cst_15 : f32 to vector<8x1xf32>
    %45 = vector.extract_strided_slice %1 {offsets = [0, 1], sizes = [8, 255], strides = [1, 1]} : vector<8x256xf32> to vector<8x255xf32>
    %46 = tpu.concatenate %45, %44 in 1 : vector<8x255xf32>, vector<8x1xf32> -> vector<8x256xf32>
    %c14_i32_16 = arith.constant 14 : i32
    %47 = vector.broadcast %c14_i32_16 : i32 to vector<8x256xi32>
    %48 = arith.cmpi sle, %19, %47 : vector<8x256xi32>
    %cst_17 = arith.constant 0.000000e+00 : f32
    %49 = vector.broadcast %cst_17 : f32 to vector<8x256xf32>
    %50 = arith.select %48, %46, %49 : vector<8x256xi1>, vector<8x256xf32>
    %cst_18 = arith.constant 0.000000e+00 : f32
    %51 = vector.broadcast %cst_18 : f32 to vector<8x15xf32>
    %52 = vector.extract_strided_slice %1 {offsets = [0, 15], sizes = [8, 241], strides = [1, 1]} : vector<8x256xf32> to vector<8x241xf32>
    %53 = tpu.concatenate %52, %51 in 1 : vector<8x241xf32>, vector<8x15xf32> -> vector<8x256xf32>
    %c1_i32_19 = arith.constant 1 : i32
    %54 = vector.broadcast %c1_i32_19 : i32 to vector<8x256xi32>
    %55 = arith.cmpi sge, %19, %54 : vector<8x256xi32>
    %cst_20 = arith.constant 0.000000e+00 : f32
    %56 = vector.broadcast %cst_20 : f32 to vector<8x256xf32>
    %57 = arith.select %55, %53, %56 : vector<8x256xi1>, vector<8x256xf32>
    %cst_21 = arith.constant 0.000000e+00 : f32
    %58 = vector.broadcast %cst_21 : f32 to vector<8x16xf32>
    %59 = vector.extract_strided_slice %1 {offsets = [0, 16], sizes = [8, 240], strides = [1, 1]} : vector<8x256xf32> to vector<8x240xf32>
    %60 = tpu.concatenate %59, %58 in 1 : vector<8x240xf32>, vector<8x16xf32> -> vector<8x256xf32>
    %cst_22 = arith.constant 0.000000e+00 : f32
    %61 = vector.broadcast %cst_22 : f32 to vector<8x17xf32>
    %62 = vector.extract_strided_slice %1 {offsets = [0, 17], sizes = [8, 239], strides = [1, 1]} : vector<8x256xf32> to vector<8x239xf32>
    %63 = tpu.concatenate %62, %61 in 1 : vector<8x239xf32>, vector<8x17xf32> -> vector<8x256xf32>
    %c14_i32_23 = arith.constant 14 : i32
    %64 = vector.broadcast %c14_i32_23 : i32 to vector<8x256xi32>
    %65 = arith.cmpi sle, %19, %64 : vector<8x256xi32>
    %cst_24 = arith.constant 0.000000e+00 : f32
    %66 = vector.broadcast %cst_24 : f32 to vector<8x256xf32>
    %67 = arith.select %65, %63, %66 : vector<8x256xi1>, vector<8x256xf32>
    %68 = tpu.concatenate %26, %29, %36, %43, %1, %50, %57, %60, %67 in 0 : vector<8x256xf32>, vector<8x256xf32>, vector<8x256xf32>, vector<8x256xf32>, vector<8x256xf32>, vector<8x256xf32>, vector<8x256xf32>, vector<8x256xf32>, vector<8x256xf32> -> vector<72x256xf32>
    %cst_25 = arith.constant dense<0.000000e+00> : vector<8x256xf32>
    %69 = tpu.matmul %2, %68, %cst_25 {dimension_numbers = #tpu.dot_dimension_numbers<[1], [0], [0], [1], [0, 0, 1, 1], [], []>} : vector<8x72xf32>, vector<72x256xf32>, vector<8x256xf32> -> vector<8x256xf32>
    %c0_26 = arith.constant 0 : index
    %c0_27 = arith.constant 0 : index
    %70 = vector.load %arg4[%c0_26, %c0_27] : memref<256x64xf32, #tpu.memory_space<vmem>>, vector<256x64xf32>
    %cst_28 = arith.constant dense<0.000000e+00> : vector<8x64xf32>
    %71 = tpu.matmul %69, %70, %cst_28 {dimension_numbers = #tpu.dot_dimension_numbers<[1], [0], [0], [1], [0, 0, 1, 1], [], []>} : vector<8x256xf32>, vector<256x64xf32>, vector<8x64xf32> -> vector<8x64xf32>
    %c0_29 = arith.constant 0 : index
    %c0_30 = arith.constant 0 : index
    %c0_31 = arith.constant 0 : index
    %72 = vector.load %arg5[%c0_29, %c0_30, %c0_31] : memref<1x8x64xf32, #tpu.memory_space<vmem>>, vector<1x8x64xf32>
    %73 = vector.shape_cast %72 : vector<1x8x64xf32> to vector<8x64xf32>
    %74 = vector.shape_cast %71 : vector<8x64xf32> to vector<1x8x64xf32>
    tpu.vector_store %arg5[%c0_29, %c0_30, %c0_31], %74 {strides = array<i32>} : memref<1x8x64xf32, #tpu.memory_space<vmem>>, vector<1x8x64xf32>,
    %cst_32 = arith.constant dense<0.000000e+00> : vector<8xf32>
    %75 = vector.multi_reduction <add>, %71, %cst_32 [1] : vector<8x64xf32> to vector<8xf32>
    %76 = vector.shape_cast %75 : vector<8xf32> to vector<8x1xf32>
    %77 = arith.mulf %71, %71 : vector<8x64xf32>
    %cst_33 = arith.constant dense<0.000000e+00> : vector<8xf32>
    %78 = vector.multi_reduction <add>, %77, %cst_33 [1] : vector<8x64xf32> to vector<8xf32>
    %79 = vector.shape_cast %78 : vector<8xf32> to vector<8x1xf32>
    %80 = tpu.concatenate %76, %79 in 1 : vector<8x1xf32>, vector<8x1xf32> -> vector<8x2xf32>
    %c0_34 = arith.constant 0 : index
    %c0_35 = arith.constant 0 : index
    %c0_36 = arith.constant 0 : index
    %81 = vector.load %arg6[%c0_34, %c0_35, %c0_36] : memref<1x8x2xf32, #tpu.memory_space<vmem>>, vector<1x8x2xf32>
    %82 = vector.shape_cast %81 : vector<1x8x2xf32> to vector<8x2xf32>
    %83 = vector.shape_cast %80 : vector<8x2xf32> to vector<1x8x2xf32>
    tpu.vector_store %arg6[%c0_34, %c0_35, %c0_36], %83 {strides = array<i32>} : memref<1x8x2xf32, #tpu.memory_space<vmem>>, vector<1x8x2xf32>,
    %c0_37 = arith.constant 0 : index
    %c0_38 = arith.constant 0 : index
    %84 = vector.load %arg3[%c0_37, %c0_38] : memref<8x8xf32, #tpu.memory_space<vmem>>, vector<8x8xf32>
    %cst_39 = arith.constant dense<0.000000e+00> : vector<8x256xf32>
    %85 = tpu.matmul %84, %1, %cst_39 {dimension_numbers = #tpu.dot_dimension_numbers<[1], [0], [0], [1], [0, 0, 1, 1], [], []>} : vector<8x8xf32>, vector<8x256xf32>, vector<8x256xf32> -> vector<8x256xf32>
    %c0_40 = arith.constant 0 : index
    %c0_41 = arith.constant 0 : index
    %86 = vector.load %arg4[%c0_40, %c0_41] : memref<256x64xf32, #tpu.memory_space<vmem>>, vector<256x64xf32>
    %cst_42 = arith.constant dense<0.000000e+00> : vector<8x64xf32>
    %87 = tpu.matmul %85, %86, %cst_42 {dimension_numbers = #tpu.dot_dimension_numbers<[1], [0], [0], [1], [0, 0, 1, 1], [], []>} : vector<8x256xf32>, vector<256x64xf32>, vector<8x64xf32> -> vector<8x64xf32>
    %c0_43 = arith.constant 0 : index
    %c0_44 = arith.constant 0 : index
    %c0_45 = arith.constant 0 : index
    %88 = vector.load %arg7[%c0_43, %c0_44, %c0_45] : memref<1x8x64xf32, #tpu.memory_space<vmem>>, vector<1x8x64xf32>
    %89 = vector.shape_cast %88 : vector<1x8x64xf32> to vector<8x64xf32>
    %90 = vector.shape_cast %87 : vector<8x64xf32> to vector<1x8x64xf32>
    tpu.vector_store %arg7[%c0_43, %c0_44, %c0_45], %90 {strides = array<i32>} : memref<1x8x64xf32, #tpu.memory_space<vmem>>, vector<1x8x64xf32>,
    %cst_46 = arith.constant dense<0.000000e+00> : vector<8xf32>
    %91 = vector.multi_reduction <add>, %87, %cst_46 [1] : vector<8x64xf32> to vector<8xf32>
    %92 = vector.shape_cast %91 : vector<8xf32> to vector<8x1xf32>
    %93 = arith.mulf %87, %87 : vector<8x64xf32>
    %cst_47 = arith.constant dense<0.000000e+00> : vector<8xf32>
    %94 = vector.multi_reduction <add>, %93, %cst_47 [1] : vector<8x64xf32> to vector<8xf32>
    %95 = vector.shape_cast %94 : vector<8xf32> to vector<8x1xf32>
    %96 = tpu.concatenate %92, %95 in 1 : vector<8x1xf32>, vector<8x1xf32> -> vector<8x2xf32>
    %c0_48 = arith.constant 0 : index
    %c0_49 = arith.constant 0 : index
    %c0_50 = arith.constant 0 : index
    %97 = vector.load %arg8[%c0_48, %c0_49, %c0_50] : memref<1x8x2xf32, #tpu.memory_space<vmem>>, vector<1x8x2xf32>
    %98 = vector.shape_cast %97 : vector<1x8x2xf32> to vector<8x2xf32>
    %99 = vector.shape_cast %96 : vector<8x2xf32> to vector<1x8x2xf32>
    tpu.vector_store %arg8[%c0_48, %c0_49, %c0_50], %99 {strides = array<i32>} : memref<1x8x2xf32, #tpu.memory_space<vmem>>, vector<1x8x2xf32>,
    return
  }
  func.func @transform_0(%arg0: i32) -> (i32, i32, i32) {
    %c0_i32 = arith.constant 0 : i32
    %c0_i32_0 = arith.constant 0 : i32
    %c0_i32_1 = arith.constant 0 : i32
    return %arg0, %c0_i32, %c0_i32_0 : i32, i32, i32
  }
  func.func @transform_1(%arg0: i32) -> (i32, i32) {
    %c0_i32 = arith.constant 0 : i32
    %c0_i32_0 = arith.constant 0 : i32
    %c0_i32_1 = arith.constant 0 : i32
    return %c0_i32, %c0_i32_0 : i32, i32
  }
  func.func @transform_2(%arg0: i32) -> (i32, i32) {
    %c0_i32 = arith.constant 0 : i32
    %c0_i32_0 = arith.constant 0 : i32
    %c0_i32_1 = arith.constant 0 : i32
    return %c0_i32, %c0_i32_0 : i32, i32
  }
  func.func @transform_3(%arg0: i32) -> (i32, i32) {
    %c0_i32 = arith.constant 0 : i32
    %c0_i32_0 = arith.constant 0 : i32
    %c0_i32_1 = arith.constant 0 : i32
    return %c0_i32, %c0_i32_0 : i32, i32
  }
  func.func @transform_4(%arg0: i32) -> (i32, i32, i32) {
    %c0_i32 = arith.constant 0 : i32
    %c0_i32_0 = arith.constant 0 : i32
    %c0_i32_1 = arith.constant 0 : i32
    return %arg0, %c0_i32, %c0_i32_0 : i32, i32, i32
  }
  func.func @transform_5(%arg0: i32) -> (i32, i32, i32) {
    %c0_i32 = arith.constant 0 : i32
    %c0_i32_0 = arith.constant 0 : i32
    %c0_i32_1 = arith.constant 0 : i32
    return %arg0, %c0_i32, %c0_i32_0 : i32, i32, i32
  }
  func.func @transform_6(%arg0: i32) -> (i32, i32, i32) {
    %c0_i32 = arith.constant 0 : i32
    %c0_i32_0 = arith.constant 0 : i32
    %c0_i32_1 = arith.constant 0 : i32
    return %arg0, %c0_i32, %c0_i32_0 : i32, i32, i32
  }
  func.func @transform_7(%arg0: i32) -> (i32, i32, i32) {
    %c0_i32 = arith.constant 0 : i32
    %c0_i32_0 = arith.constant 0 : i32
    %c0_i32_1 = arith.constant 0 : i32
    return %arg0, %c0_i32, %c0_i32_0 : i32, i32, i32
  }
}

module attributes {stable_mosaic.version = 11 : i64} {
  func.func @_stage3_kernel(%arg0: i32, %arg1: memref<1x8x64xf32, #tpu.memory_space<vmem>>, %arg2: memref<8x1xf32, #tpu.memory_space<vmem>>, %arg3: memref<8x1xf32, #tpu.memory_space<vmem>>, %arg4: memref<1x8x64xf32, #tpu.memory_space<vmem>>, %arg5: memref<8x1xf32, #tpu.memory_space<vmem>>, %arg6: memref<8x1xf32, #tpu.memory_space<vmem>>, %arg7: memref<1x8x64xf32, #tpu.memory_space<vmem>>) attributes {dimension_semantics = [#tpu.dimension_semantics<parallel>], iteration_bounds = array<i64: 2>, scalar_prefetch = 0 : i64, scratch_operands = 0 : i64, tpu.core_type = #tpu.core_type<tc>, window_params = [{transform_indices = @transform_0, window_bounds = array<i64: 1, 8, 64>}, {pipeline_mode = #tpu.pipeline_mode<synchronous>, transform_indices = @transform_1, window_bounds = array<i64: 8, 1>}, {pipeline_mode = #tpu.pipeline_mode<synchronous>, transform_indices = @transform_2, window_bounds = array<i64: 8, 1>}, {transform_indices = @transform_3, window_bounds = array<i64: 1, 8, 64>}, {pipeline_mode = #tpu.pipeline_mode<synchronous>, transform_indices = @transform_4, window_bounds = array<i64: 8, 1>}, {pipeline_mode = #tpu.pipeline_mode<synchronous>, transform_indices = @transform_5, window_bounds = array<i64: 8, 1>}, {transform_indices = @transform_6, window_bounds = array<i64: 1, 8, 64>}]} {
    %c0 = arith.constant 0 : index
    %c0_0 = arith.constant 0 : index
    %c0_1 = arith.constant 0 : index
    %0 = vector.load %arg1[%c0, %c0_0, %c0_1] : memref<1x8x64xf32, #tpu.memory_space<vmem>>, vector<1x8x64xf32>
    %1 = vector.shape_cast %0 : vector<1x8x64xf32> to vector<8x64xf32>
    %c0_2 = arith.constant 0 : index
    %c0_3 = arith.constant 0 : index
    %2 = vector.load %arg2[%c0_2, %c0_3] : memref<8x1xf32, #tpu.memory_space<vmem>>, vector<8x1xf32>
    %3 = vector.broadcast %2 : vector<8x1xf32> to vector<8x64xf32>
    %4 = arith.mulf %1, %3 : vector<8x64xf32>
    %c0_4 = arith.constant 0 : index
    %c0_5 = arith.constant 0 : index
    %5 = vector.load %arg3[%c0_4, %c0_5] : memref<8x1xf32, #tpu.memory_space<vmem>>, vector<8x1xf32>
    %6 = vector.broadcast %5 : vector<8x1xf32> to vector<8x64xf32>
    %7 = arith.addf %4, %6 : vector<8x64xf32>
    %c0_6 = arith.constant 0 : index
    %c0_7 = arith.constant 0 : index
    %c0_8 = arith.constant 0 : index
    %8 = vector.load %arg4[%c0_6, %c0_7, %c0_8] : memref<1x8x64xf32, #tpu.memory_space<vmem>>, vector<1x8x64xf32>
    %9 = vector.shape_cast %8 : vector<1x8x64xf32> to vector<8x64xf32>
    %c0_9 = arith.constant 0 : index
    %c0_10 = arith.constant 0 : index
    %10 = vector.load %arg5[%c0_9, %c0_10] : memref<8x1xf32, #tpu.memory_space<vmem>>, vector<8x1xf32>
    %11 = vector.broadcast %10 : vector<8x1xf32> to vector<8x64xf32>
    %12 = arith.mulf %9, %11 : vector<8x64xf32>
    %13 = arith.addf %7, %12 : vector<8x64xf32>
    %c0_11 = arith.constant 0 : index
    %c0_12 = arith.constant 0 : index
    %14 = vector.load %arg6[%c0_11, %c0_12] : memref<8x1xf32, #tpu.memory_space<vmem>>, vector<8x1xf32>
    %15 = vector.broadcast %14 : vector<8x1xf32> to vector<8x64xf32>
    %16 = arith.addf %13, %15 : vector<8x64xf32>
    %cst = arith.constant 0.000000e+00 : f32
    %17 = vector.broadcast %cst : f32 to vector<8x64xf32>
    %18 = arith.maximumf %16, %17 : vector<8x64xf32>
    %c0_13 = arith.constant 0 : index
    %c0_14 = arith.constant 0 : index
    %c0_15 = arith.constant 0 : index
    %19 = vector.load %arg7[%c0_13, %c0_14, %c0_15] : memref<1x8x64xf32, #tpu.memory_space<vmem>>, vector<1x8x64xf32>
    %20 = vector.shape_cast %19 : vector<1x8x64xf32> to vector<8x64xf32>
    %21 = vector.shape_cast %18 : vector<8x64xf32> to vector<1x8x64xf32>
    tpu.vector_store %arg7[%c0_13, %c0_14, %c0_15], %21 {strides = array<i32>} : memref<1x8x64xf32, #tpu.memory_space<vmem>>, vector<1x8x64xf32>,
    return
  }
  func.func @transform_0(%arg0: i32) -> (i32, i32, i32) {
    %c0_i32 = arith.constant 0 : i32
    %c0_i32_0 = arith.constant 0 : i32
    %c0_i32_1 = arith.constant 0 : i32
    return %arg0, %c0_i32, %c0_i32_0 : i32, i32, i32
  }
  func.func @transform_1(%arg0: i32) -> (i32, i32) {
    %c0_i32 = arith.constant 0 : i32
    %c0_i32_0 = arith.constant 0 : i32
    %c0_i32_1 = arith.constant 0 : i32
    return %c0_i32, %c0_i32_0 : i32, i32
  }
  func.func @transform_2(%arg0: i32) -> (i32, i32) {
    %c0_i32 = arith.constant 0 : i32
    %c0_i32_0 = arith.constant 0 : i32
    %c0_i32_1 = arith.constant 0 : i32
    return %c0_i32, %c0_i32_0 : i32, i32
  }
  func.func @transform_3(%arg0: i32) -> (i32, i32, i32) {
    %c0_i32 = arith.constant 0 : i32
    %c0_i32_0 = arith.constant 0 : i32
    %c0_i32_1 = arith.constant 0 : i32
    return %arg0, %c0_i32, %c0_i32_0 : i32, i32, i32
  }
  func.func @transform_4(%arg0: i32) -> (i32, i32) {
    %c0_i32 = arith.constant 0 : i32
    %c0_i32_0 = arith.constant 0 : i32
    %c0_i32_1 = arith.constant 0 : i32
    return %c0_i32, %c0_i32_0 : i32, i32
  }
  func.func @transform_5(%arg0: i32) -> (i32, i32) {
    %c0_i32 = arith.constant 0 : i32
    %c0_i32_0 = arith.constant 0 : i32
    %c0_i32_1 = arith.constant 0 : i32
    return %c0_i32, %c0_i32_0 : i32, i32
  }
  func.func @transform_6(%arg0: i32) -> (i32, i32, i32) {
    %c0_i32 = arith.constant 0 : i32
    %c0_i32_0 = arith.constant 0 : i32
    %c0_i32_1 = arith.constant 0 : i32
    return %arg0, %c0_i32, %c0_i32_0 : i32, i32, i32
  }
}

module attributes {stable_mosaic.version = 11 : i64} {
  func.func @kernel(%arg0: i32, %arg1: memref<1x8x64xf32, #tpu.memory_space<vmem>>, %arg2: memref<8x1xf32, #tpu.memory_space<vmem>>, %arg3: memref<8x1xf32, #tpu.memory_space<vmem>>, %arg4: memref<8x72xf32, #tpu.memory_space<vmem>>, %arg5: memref<1x8x64xf32, #tpu.memory_space<vmem>>, %arg6: memref<1x8x2xf32, #tpu.memory_space<vmem>>) attributes {dimension_semantics = [#tpu.dimension_semantics<parallel>], iteration_bounds = array<i64: 2>, scalar_prefetch = 0 : i64, scratch_operands = 0 : i64, tpu.core_type = #tpu.core_type<tc>, window_params = [{transform_indices = @transform_0, window_bounds = array<i64: 1, 8, 64>}, {pipeline_mode = #tpu.pipeline_mode<synchronous>, transform_indices = @transform_1, window_bounds = array<i64: 8, 1>}, {pipeline_mode = #tpu.pipeline_mode<synchronous>, transform_indices = @transform_2, window_bounds = array<i64: 8, 1>}, {pipeline_mode = #tpu.pipeline_mode<synchronous>, transform_indices = @transform_3, window_bounds = array<i64: 8, 72>}, {transform_indices = @transform_4, window_bounds = array<i64: 1, 8, 64>}, {transform_indices = @transform_5, window_bounds = array<i64: 1, 8, 2>}]} {
    %c0 = arith.constant 0 : index
    %c0_0 = arith.constant 0 : index
    %c0_1 = arith.constant 0 : index
    %0 = vector.load %arg1[%c0, %c0_0, %c0_1] : memref<1x8x64xf32, #tpu.memory_space<vmem>>, vector<1x8x64xf32>
    %1 = vector.shape_cast %0 : vector<1x8x64xf32> to vector<8x64xf32>
    %c0_2 = arith.constant 0 : index
    %c0_3 = arith.constant 0 : index
    %2 = vector.load %arg2[%c0_2, %c0_3] : memref<8x1xf32, #tpu.memory_space<vmem>>, vector<8x1xf32>
    %3 = vector.broadcast %2 : vector<8x1xf32> to vector<8x64xf32>
    %4 = arith.mulf %1, %3 : vector<8x64xf32>
    %c0_4 = arith.constant 0 : index
    %c0_5 = arith.constant 0 : index
    %5 = vector.load %arg3[%c0_4, %c0_5] : memref<8x1xf32, #tpu.memory_space<vmem>>, vector<8x1xf32>
    %6 = vector.broadcast %5 : vector<8x1xf32> to vector<8x64xf32>
    %7 = arith.addf %4, %6 : vector<8x64xf32>
    %cst = arith.constant 0.000000e+00 : f32
    %8 = vector.broadcast %cst : f32 to vector<8x64xf32>
    %9 = arith.maximumf %7, %8 : vector<8x64xf32>
    %c0_6 = arith.constant 0 : index
    %c0_7 = arith.constant 0 : index
    %10 = vector.load %arg4[%c0_6, %c0_7] : memref<8x72xf32, #tpu.memory_space<vmem>>, vector<8x72xf32>
    %11 = tpu.iota {dimensions = array<i32: 1>} : vector<8x64xi32>
    %c8_i32 = arith.constant 8 : i32
    %c0_i32 = arith.constant 0 : i32
    %12 = arith.cmpi eq, %c8_i32, %c0_i32 : i32
    %c1_i32 = arith.constant 1 : i32
    %13 = arith.select %12, %c1_i32, %c8_i32 : i32
    %14 = vector.broadcast %13 : i32 to vector<8x64xi32>
    %15 = arith.remsi %11, %14 : vector<8x64xi32>
    %c0_i32_8 = arith.constant 0 : i32
    %16 = vector.broadcast %c0_i32_8 : i32 to vector<8x64xi32>
    %17 = arith.cmpi ne, %15, %16 : vector<8x64xi32>
    %c0_i32_9 = arith.constant 0 : i32
    %18 = vector.broadcast %c0_i32_9 : i32 to vector<8x64xi32>
    %19 = arith.cmpi slt, %15, %18 : vector<8x64xi32>
    %c0_i32_10 = arith.constant 0 : i32
    %20 = arith.cmpi slt, %13, %c0_i32_10 : i32
    %21 = vector.broadcast %20 : i1 to vector<8x64xi1>
    %22 = vector.broadcast %21 : vector<8x64xi1> to vector<8x64xi1>
    %23 = arith.xori %19, %22 : vector<8x64xi1>
    %24 = arith.andi %23, %17 : vector<8x64xi1>
    %25 = vector.broadcast %13 : i32 to vector<8x64xi32>
    %26 = arith.addi %15, %25 : vector<8x64xi32>
    %27 = arith.select %24, %26, %15 : vector<8x64xi1>, vector<8x64xi32>
    %cst_11 = arith.constant 0.000000e+00 : f32
    %28 = vector.broadcast %cst_11 : f32 to vector<8x9xf32>
    %29 = vector.extract_strided_slice %9 {offsets = [0, 0], sizes = [8, 55], strides = [1, 1]} : vector<8x64xf32> to vector<8x55xf32>
    %30 = tpu.concatenate %28, %29 in 1 : vector<8x9xf32>, vector<8x55xf32> -> vector<8x64xf32>
    %c1_i32_12 = arith.constant 1 : i32
    %31 = vector.broadcast %c1_i32_12 : i32 to vector<8x64xi32>
    %32 = arith.cmpi sge, %27, %31 : vector<8x64xi32>
    %cst_13 = arith.constant 0.000000e+00 : f32
    %33 = vector.broadcast %cst_13 : f32 to vector<8x64xf32>
    %34 = arith.select %32, %30, %33 : vector<8x64xi1>, vector<8x64xf32>
    %cst_14 = arith.constant 0.000000e+00 : f32
    %35 = vector.broadcast %cst_14 : f32 to vector<8x8xf32>
    %36 = vector.extract_strided_slice %9 {offsets = [0, 0], sizes = [8, 56], strides = [1, 1]} : vector<8x64xf32> to vector<8x56xf32>
    %37 = tpu.concatenate %35, %36 in 1 : vector<8x8xf32>, vector<8x56xf32> -> vector<8x64xf32>
    %cst_15 = arith.constant 0.000000e+00 : f32
    %38 = vector.broadcast %cst_15 : f32 to vector<8x7xf32>
    %39 = vector.extract_strided_slice %9 {offsets = [0, 0], sizes = [8, 57], strides = [1, 1]} : vector<8x64xf32> to vector<8x57xf32>
    %40 = tpu.concatenate %38, %39 in 1 : vector<8x7xf32>, vector<8x57xf32> -> vector<8x64xf32>
    %c6_i32 = arith.constant 6 : i32
    %41 = vector.broadcast %c6_i32 : i32 to vector<8x64xi32>
    %42 = arith.cmpi sle, %27, %41 : vector<8x64xi32>
    %cst_16 = arith.constant 0.000000e+00 : f32
    %43 = vector.broadcast %cst_16 : f32 to vector<8x64xf32>
    %44 = arith.select %42, %40, %43 : vector<8x64xi1>, vector<8x64xf32>
    %cst_17 = arith.constant 0.000000e+00 : f32
    %45 = vector.broadcast %cst_17 : f32 to vector<8x1xf32>
    %46 = vector.extract_strided_slice %9 {offsets = [0, 0], sizes = [8, 63], strides = [1, 1]} : vector<8x64xf32> to vector<8x63xf32>
    %47 = tpu.concatenate %45, %46 in 1 : vector<8x1xf32>, vector<8x63xf32> -> vector<8x64xf32>
    %c1_i32_18 = arith.constant 1 : i32
    %48 = vector.broadcast %c1_i32_18 : i32 to vector<8x64xi32>
    %49 = arith.cmpi sge, %27, %48 : vector<8x64xi32>
    %cst_19 = arith.constant 0.000000e+00 : f32
    %50 = vector.broadcast %cst_19 : f32 to vector<8x64xf32>
    %51 = arith.select %49, %47, %50 : vector<8x64xi1>, vector<8x64xf32>
    %cst_20 = arith.constant 0.000000e+00 : f32
    %52 = vector.broadcast %cst_20 : f32 to vector<8x1xf32>
    %53 = vector.extract_strided_slice %9 {offsets = [0, 1], sizes = [8, 63], strides = [1, 1]} : vector<8x64xf32> to vector<8x63xf32>
    %54 = tpu.concatenate %53, %52 in 1 : vector<8x63xf32>, vector<8x1xf32> -> vector<8x64xf32>
    %c6_i32_21 = arith.constant 6 : i32
    %55 = vector.broadcast %c6_i32_21 : i32 to vector<8x64xi32>
    %56 = arith.cmpi sle, %27, %55 : vector<8x64xi32>
    %cst_22 = arith.constant 0.000000e+00 : f32
    %57 = vector.broadcast %cst_22 : f32 to vector<8x64xf32>
    %58 = arith.select %56, %54, %57 : vector<8x64xi1>, vector<8x64xf32>
    %cst_23 = arith.constant 0.000000e+00 : f32
    %59 = vector.broadcast %cst_23 : f32 to vector<8x7xf32>
    %60 = vector.extract_strided_slice %9 {offsets = [0, 7], sizes = [8, 57], strides = [1, 1]} : vector<8x64xf32> to vector<8x57xf32>
    %61 = tpu.concatenate %60, %59 in 1 : vector<8x57xf32>, vector<8x7xf32> -> vector<8x64xf32>
    %c1_i32_24 = arith.constant 1 : i32
    %62 = vector.broadcast %c1_i32_24 : i32 to vector<8x64xi32>
    %63 = arith.cmpi sge, %27, %62 : vector<8x64xi32>
    %cst_25 = arith.constant 0.000000e+00 : f32
    %64 = vector.broadcast %cst_25 : f32 to vector<8x64xf32>
    %65 = arith.select %63, %61, %64 : vector<8x64xi1>, vector<8x64xf32>
    %cst_26 = arith.constant 0.000000e+00 : f32
    %66 = vector.broadcast %cst_26 : f32 to vector<8x8xf32>
    %67 = vector.extract_strided_slice %9 {offsets = [0, 8], sizes = [8, 56], strides = [1, 1]} : vector<8x64xf32> to vector<8x56xf32>
    %68 = tpu.concatenate %67, %66 in 1 : vector<8x56xf32>, vector<8x8xf32> -> vector<8x64xf32>
    %cst_27 = arith.constant 0.000000e+00 : f32
    %69 = vector.broadcast %cst_27 : f32 to vector<8x9xf32>
    %70 = vector.extract_strided_slice %9 {offsets = [0, 9], sizes = [8, 55], strides = [1, 1]} : vector<8x64xf32> to vector<8x55xf32>
    %71 = tpu.concatenate %70, %69 in 1 : vector<8x55xf32>, vector<8x9xf32> -> vector<8x64xf32>
    %c6_i32_28 = arith.constant 6 : i32
    %72 = vector.broadcast %c6_i32_28 : i32 to vector<8x64xi32>
    %73 = arith.cmpi sle, %27, %72 : vector<8x64xi32>
    %cst_29 = arith.constant 0.000000e+00 : f32
    %74 = vector.broadcast %cst_29 : f32 to vector<8x64xf32>
    %75 = arith.select %73, %71, %74 : vector<8x64xi1>, vector<8x64xf32>
    %76 = tpu.concatenate %34, %37, %44, %51, %9, %58, %65, %68, %75 in 0 : vector<8x64xf32>, vector<8x64xf32>, vector<8x64xf32>, vector<8x64xf32>, vector<8x64xf32>, vector<8x64xf32>, vector<8x64xf32>, vector<8x64xf32>, vector<8x64xf32> -> vector<72x64xf32>
    %cst_30 = arith.constant dense<0.000000e+00> : vector<8x64xf32>
    %77 = tpu.matmul %10, %76, %cst_30 {dimension_numbers = #tpu.dot_dimension_numbers<[1], [0], [0], [1], [0, 0, 1, 1], [], []>} : vector<8x72xf32>, vector<72x64xf32>, vector<8x64xf32> -> vector<8x64xf32>
    %c0_31 = arith.constant 0 : index
    %c0_32 = arith.constant 0 : index
    %c0_33 = arith.constant 0 : index
    %78 = vector.load %arg5[%c0_31, %c0_32, %c0_33] : memref<1x8x64xf32, #tpu.memory_space<vmem>>, vector<1x8x64xf32>
    %79 = vector.shape_cast %78 : vector<1x8x64xf32> to vector<8x64xf32>
    %80 = vector.shape_cast %77 : vector<8x64xf32> to vector<1x8x64xf32>
    tpu.vector_store %arg5[%c0_31, %c0_32, %c0_33], %80 {strides = array<i32>} : memref<1x8x64xf32, #tpu.memory_space<vmem>>, vector<1x8x64xf32>,
    %cst_34 = arith.constant dense<0.000000e+00> : vector<8xf32>
    %81 = vector.multi_reduction <add>, %77, %cst_34 [1] : vector<8x64xf32> to vector<8xf32>
    %82 = vector.shape_cast %81 : vector<8xf32> to vector<8x1xf32>
    %83 = arith.mulf %77, %77 : vector<8x64xf32>
    %cst_35 = arith.constant dense<0.000000e+00> : vector<8xf32>
    %84 = vector.multi_reduction <add>, %83, %cst_35 [1] : vector<8x64xf32> to vector<8xf32>
    %85 = vector.shape_cast %84 : vector<8xf32> to vector<8x1xf32>
    %86 = tpu.concatenate %82, %85 in 1 : vector<8x1xf32>, vector<8x1xf32> -> vector<8x2xf32>
    %c0_36 = arith.constant 0 : index
    %c0_37 = arith.constant 0 : index
    %c0_38 = arith.constant 0 : index
    %87 = vector.load %arg6[%c0_36, %c0_37, %c0_38] : memref<1x8x2xf32, #tpu.memory_space<vmem>>, vector<1x8x2xf32>
    %88 = vector.shape_cast %87 : vector<1x8x2xf32> to vector<8x2xf32>
    %89 = vector.shape_cast %86 : vector<8x2xf32> to vector<1x8x2xf32>
    tpu.vector_store %arg6[%c0_36, %c0_37, %c0_38], %89 {strides = array<i32>} : memref<1x8x2xf32, #tpu.memory_space<vmem>>, vector<1x8x2xf32>,
    return
  }
  func.func @transform_0(%arg0: i32) -> (i32, i32, i32) {
    %c0_i32 = arith.constant 0 : i32
    %c0_i32_0 = arith.constant 0 : i32
    %c0_i32_1 = arith.constant 0 : i32
    return %arg0, %c0_i32, %c0_i32_0 : i32, i32, i32
  }
  func.func @transform_1(%arg0: i32) -> (i32, i32) {
    %c0_i32 = arith.constant 0 : i32
    %c0_i32_0 = arith.constant 0 : i32
    %c0_i32_1 = arith.constant 0 : i32
    return %c0_i32, %c0_i32_0 : i32, i32
  }
  func.func @transform_2(%arg0: i32) -> (i32, i32) {
    %c0_i32 = arith.constant 0 : i32
    %c0_i32_0 = arith.constant 0 : i32
    %c0_i32_1 = arith.constant 0 : i32
    return %c0_i32, %c0_i32_0 : i32, i32
  }
  func.func @transform_3(%arg0: i32) -> (i32, i32) {
    %c0_i32 = arith.constant 0 : i32
    %c0_i32_0 = arith.constant 0 : i32
    %c0_i32_1 = arith.constant 0 : i32
    return %c0_i32, %c0_i32_0 : i32, i32
  }
  func.func @transform_4(%arg0: i32) -> (i32, i32, i32) {
    %c0_i32 = arith.constant 0 : i32
    %c0_i32_0 = arith.constant 0 : i32
    %c0_i32_1 = arith.constant 0 : i32
    return %arg0, %c0_i32, %c0_i32_0 : i32, i32, i32
  }
  func.func @transform_5(%arg0: i32) -> (i32, i32, i32) {
    %c0_i32 = arith.constant 0 : i32
    %c0_i32_0 = arith.constant 0 : i32
    %c0_i32_1 = arith.constant 0 : i32
    return %arg0, %c0_i32, %c0_i32_0 : i32, i32, i32
  }
}

</mosaic_0001>

<bundles_post_ra>
// kernel: basic_block_forward.5
= control target key start
LH: loop header
LB: loop body
LE: loop exit
PB: predicated region body
PF: predicated region fallthrough
CT: control target
= control target key end

     0   :  { %s428_s21 = smov 0   ;;  %s460_s0 = inlined_call_operand.vmem [shape: f32[2,8,64], index: 0, kind: input, shape index: {}]   ;;  %s461_s1 = inlined_call_operand.vmem [shape: f32[8,1], index: 1, kind: input, shape index: {}]   ;;  %s462_s2 = inlined_call_operand.vmem [shape: f32[8,1], index: 2, kind: input, shape index: {}]   ;;  %s463_s3 = inlined_call_operand.vmem [shape: f32[2,8,64], index: 3, kind: input, shape index: {}]   ;;  %s464_s4 = inlined_call_operand.vmem [shape: f32[8,1], index: 4, kind: input, shape index: {}]   ;;  %s465_s5 = inlined_call_operand.vmem [shape: f32[8,1], index: 5, kind: input, shape index: {}]   ;;  %s466_s6 = inlined_call_operand.vmem [shape: f32[2,8,64], index: 6, kind: output, shape index: {}]  }
   0x1 LB: > { %s363_s22 = sadd.s32 4294967295, %s390_s21   ;;  %p367_p0 = scmp.ge.s32.totalorder %s390_s21, 1  ;;  %s390_s21 = sphi %s428_s21, %s16_s21  }
   0x2   : > { %p220_p1 = scmp.lt.s32.totalorder %s390_s21, 3 }
   0x4   : > { %p221_p2 = pnand %p367_p0, %p220_p1 }
   0x5   : > { %p252_p3 = scmp.lt.s32.totalorder (!%p221_p2), %s363_s22, 1 }
   0x6   : > { %224 = sbr.rel (%p221_p2) target bundleno = 145 (0x91), region = 44 }
   0xb   : > { %v280_v0 = vld [vmem:[%s464_s4] sm:$0xff]  ;;  %v392_v2 = vmov 0   ;;  %s468_s22 = smov (!%p252_p3, %s363_s22), 1  ;;  %vm296_vm0 = vcmask 523264  }
   0xc   : > { %v265_v1 = vld [vmem:[%s461_s1] sm:$0xff]  ;;  %383 = vset.pattern.permute.xlu1 %v392_v2  ;;  %382 = vset.pattern.permute.xlu0 %v392_v2  ;;  %s368_s7 = sshll.u32 %s468_s22, 3 }
   0xd   : > { %283 = vperm.xlu1 %383, %v280_v0   ;;  %268 = vperm.xlu0 %382, %v265_v1   ;;  %v288_v3 = vld [vmem:[%s465_s5] sm:$0xff]  ;;  %s255_s10 = scalar_lea.vmem %s460_s0, %s368_s7  ;;  %s259_s13 = scalar_lea.vmem %s463_s3, %s368_s7 }
   0xe   : > { %v272_v4 = vld [vmem:[%s462_s2] sm:$0xff]  ;;  %s263_s16 = scalar_lea.vmem %s466_s6, %s368_s7 }
   0xf   : > { %v264_v7 = vld [vmem:[%s255_s10] sm:$0xff] }
  0x10   : > { %v279_v8 = vld [vmem:[%s259_s13] sm:$0xff] }
  0x15   : > { %291 = vperm.xlu1 %383, %v288_v3   ;;  %275 = vperm.xlu0 %382, %v272_v4  }
  0x7f   : > { %v269_v5 = vpop.permute.xlu0 %268  ;;  %v284_v6 = vpop.permute.xlu1 %283 }
  0x80   : > { %v271_v9 = vmul.f32 %v269_v5, %v264_v7  ;;  %v286_v11 = vmul.f32 %v284_v6, %v279_v8 }
  0x87   : > { %v276_v10 = vpop.permute.xlu0 %275  ;;  %v292_v14 = vpop.permute.xlu1 %291 }
  0x88   : > { %v278_v12 = vadd.f32 %v276_v10, %v271_v9 }
  0x8a   : > { %v287_v13 = vadd.f32 %v286_v11, %v278_v12 }
  0x8c   : > { %v294_v15 = vadd.f32 %v292_v14, %v287_v13 }
  0x8e   : > { %v295_v16 = vmax.f32 %v294_v15, 0.0 }
  0x90   : > { %297 = vst.msk [vmem:[%s263_s16] sm:$0xff] %vm296_vm0, %v295_v16 }
  0x91 PF: > { %s16_s21 = sadd.s32 1, %s390_s21  }
  0x92   : > { %p13_p4 = scmp.ge.s32.totalorder %s16_s21, 4  }
  0x94   :  { %15 = sbr.rel (!%p13_p4) target bundleno = 1 (0x1), region = 77 }

// kernel: basic_block_forward.4
= control target key start
LH: loop header
LB: loop body
LE: loop exit
PB: predicated region body
PF: predicated region fallthrough
CT: control target
= control target key end

     0   :  { %s516_s18 = smov 0   ;;  %s572_s0 = inlined_call_operand.vmem [shape: f32[2,8,64], index: 0, kind: input, shape index: {}]   ;;  %s573_s1 = inlined_call_operand.vmem [shape: f32[8,1], index: 1, kind: input, shape index: {}]   ;;  %s574_s2 = inlined_call_operand.vmem [shape: f32[8,1], index: 2, kind: input, shape index: {}]   ;;  %s575_s3 = inlined_call_operand.vmem [shape: f32[8,72], index: 3, kind: input, shape index: {}]   ;;  %s576_s4 = inlined_call_operand.vmem [shape: f32[2,8,64], index: 4, kind: output, shape index: {0}]   ;;  %s577_s5 = inlined_call_operand.vmem [shape: f32[2,8,2], index: 5, kind: output, shape index: {1}]  }
   0x1 LB: > { %s431_s19 = sadd.s32 4294967295, %s475_s18   ;;  %p435_p0 = scmp.ge.s32.totalorder %s475_s18, 1  ;;  %s475_s18 = sphi %s516_s18, %s16_s18  }
   0x2   : > { %p189_p1 = scmp.lt.s32.totalorder %s475_s18, 3 }
   0x4   : > { %p190_p2 = pnand %p435_p0, %p189_p1 }
   0x5   : > { %p219_p3 = scmp.lt.s32.totalorder (!%p190_p2), %s431_s19, 1  ;;  %s478_s28 = smov (!%p190_p2), 1  }
   0x6   : > { %193 = sbr.rel (%p190_p2) target bundleno = 526 (0x20e), region = 36  ;;  %s479_s29 = smov (!%p190_p2), 121  }
   0x7   : > { %s480_s30 = smov (!%p190_p2), 119   ;;  %s481_s6 = smov (!%p190_p2), 9  }
   0x8   : > { %s482_s7 = smov (!%p190_p2), 127   ;;  %s483_s8 = smov (!%p190_p2), 120  }
   0x9   : > { %s484_s9 = smov (!%p190_p2), 8   ;;  %s485_s10 = smov (!%p190_p2), 7  }
   0xb   : > { %v232_v0 = vld [vmem:[%s573_s1] sm:$0xff]  ;;  %v477_v1 = vmov 0   ;;  %s583_s19 = smov (!%p219_p3, %s431_s19), 1  ;;  %v248_v9 = vlaneseq  ;;  %vm308_vm0 = vcmask 449536   ;;  %vm303_vm2 = vcmask 457728  }
   0xc   : > { %468 = vset.pattern.permute.xlu0 %v477_v1  ;;  %v239_v2 = vld [vmem:[%s574_s2] sm:$0xff]  ;;  %s530_s24 = sshll.u32 %s583_s19, 3  ;;  %vm297_vm3 = vcmask 465920   ;;  %vm291_vm5 = vcmask 515072   ;;  %vm285_vm6 = vcmask 7168   ;;  %vm278_vm7 = vcmask 56320  }
   0xd   : > { %235 = vperm.xlu0 %468, %v232_v0   ;;  %s222_s27 = scalar_lea.vmem %s572_s0, %s530_s24  ;;  %v249_v10 = vand.u32 127, %v248_v9  ;;  %vm273_vm8 = vcmask 64512   ;;  %vm266_vm10 = vcmask 72704   ;;  %v247_v27 = vld [vmem:[%s575_s3] sm:$0xff]  ;;  %vm311_vm11 = vcmask 588800   ;;  %s226_s15 = scalar_lea.vmem %s576_s4, %s530_s24 }
   0xe   : > { %v231_v4 = vld [vmem:[%s222_s27] sm:$0xff]  ;;  %vm445_vm9 = vmneg %vm273_vm8  ;;  %vm335_vm12 = vcmask 523264   ;;  %s230_s19 = scalar_lea.vmem %s577_s5, %s530_s24  ;;  %vm345_vm13 = vcmask 15360  }
   0xf   : > { %v254_v11 = vand.u32 7, %v249_v10 }
  0x11   : > { %vm536_vm1 = vcmp.le.s32.totalorder %v254_v11, 6  ;;  %vm542_vm4 = vcmp.ge.s32.totalorder %v254_v11, 1 }
  0x15   : > { %242 = vperm.xlu0 %468, %v239_v2  }
  0x7f   : > { %v236_v3 = vpop.permute.xlu0 %235 }
  0x80   : > { %v238_v5 = vmul.f32 %v236_v3, %v231_v4 }
  0x87   : > { %v243_v6 = vpop.permute.xlu0 %242 }
  0x88   : > { %v245_v7 = vadd.f32 %v243_v6, %v238_v5 }
  0x8a   : > { %v246_v8 = vmax.f32 %v245_v7, 0.0 }
  0x8c   : > { %282 = vrot.lane.b32.xlu0 %v246_v8, %s478_s28  ;;  %294 = vrot.lane.b32.xlu2 %v246_v8, %s479_s29 }
  0x8d   : > { %305 = vrot.lane.b32.xlu1 %v246_v8, %s480_s30 }
  0x94   : > { %263 = vrot.lane.b32.xlu0 %v246_v8, %s481_s6  ;;  %288 = vrot.lane.b32.xlu2 %v246_v8, %s482_s7 }
  0x95   : > { %300 = vrot.lane.b32.xlu1 %v246_v8, %s483_s8 }
  0x9c   : > { %270 = vrot.lane.b32.xlu2 %v246_v8, %s484_s9 }
  0x9d   : > { %275 = vrot.lane.b32.xlu1 %v246_v8, %s485_s10 }
  0xe6   : > { %v295_v12 = vpop.permute.xlu2 %294 }
  0xe7   : > { %v298_v20 = vsel %vm297_vm3, %v295_v12, 0.0 }
  0xee   : > { %v289_v18 = vpop.permute.xlu2 %288 }
  0xef   : > { %v292_v21 = vsel %vm291_vm5, %v289_v18, 0.0 }
  0xf6   : > { %v271_v26 = vpop.permute.xlu2 %270 }
  0xfe   : > { %v283_v19 = vpop.permute.xlu0 %282 }
  0xff   : > { %v306_v14 = vpop.permute.xlu1 %305  ;;  %v286_v22 = vsel %vm285_vm6, 0.0, %v283_v19 }
 0x100   : > { %v309_v15 = vsel %vm308_vm0, %v306_v14, 0.0 }
 0x101   : > { %439 = vmatpush.msk.msra.mxu0 %vm536_vm1, %v309_v15 }
 0x106   : > { %v264_v25 = vpop.permute.xlu0 %263 }
 0x107   : > { %v301_v16 = vpop.permute.xlu1 %300  ;;  %v267_v28 = vsel %vm266_vm10, 0.0, %v264_v25 }
 0x108   : > { %440 = vmatpush.msk.msra.mxu0 %vm303_vm2, %v301_v16 }
 0x10a   : > { %441 = vmatpush.msk.msra.mxu0 %vm542_vm4, %v298_v20 }
 0x10c   : > { %442 = vmatpush.msk.msra.mxu0 %vm536_vm1, %v292_v21 }
 0x10e   : > { %326 = vmatpush.msra.mxu0 %v246_v8 }
 0x10f   : > { %v276_v23 = vpop.permute.xlu1 %275 }
 0x110   : > { %v279_v24 = vsel %vm278_vm7, 0.0, %v276_v23  ;;  %443 = vmatpush.msk.msra.mxu0 %vm542_vm4, %v286_v22 }
 0x112   : > { %444 = vmatpush.msk.msra.mxu0 %vm536_vm1, %v279_v24 }
 0x114   : > { %446 = vmatpush.msk.msra.mxu0 %vm445_vm9, %v271_v26 }
 0x116   : > { %447 = vmatpush.msk.msra.mxu0 %vm542_vm4, %v267_v28 }
 0x117   : > { %448 = vmatmul.msk.f32.vlgmr.msra.gmra.mxu0 %vm311_vm11, %v247_v27 }
 0x194   : > { %v332_v29 = vpop.f32.mrf.mxu0 }
 0x195   : > { %336 = vst.msk [vmem:[%s226_s15] sm:$0xff] %vm335_vm12, %v332_v29  ;;  %v340_v30 = vmul.f32 %v332_v29, %v332_v29  ;;  %v337_v31 = vsel %vm335_vm12, %v332_v29, 0.0 }
 0x196   : > { %338 = vadd.xlane.f32.xlu1 %v337_v31 }
 0x197   : > { %v341_v32 = vsel %vm335_vm12, %v340_v30, 0.0 }
 0x198   : > { %342 = vadd.xlane.f32.xlu2 %v341_v32 }
 0x209   : > { %v339_v33 = vpop.xlane.xlu1 %338 }
 0x20b   : > { %v343_v34 = vpop.xlane.xlu2 %342 }
 0x20c   : > { %v344_v35 = vsel %vm285_vm6, %v339_v33, %v343_v34 }
 0x20d   : > { %346 = vst.msk [vmem:[%s230_s19] sm:$0xff] %vm345_vm13, %v344_v35 }
 0x20e PF: > { %s16_s18 = sadd.s32 1, %s475_s18  }
 0x20f   : > { %p13_p4 = scmp.ge.s32.totalorder %s16_s18, 4  }
 0x211   :  { %15 = sbr.rel (!%p13_p4) target bundleno = 1 (0x1), region = 78 }

// kernel: basic_block_forward.3
= control target key start
LH: loop header
LB: loop body
LE: loop exit
PB: predicated region body
PF: predicated region fallthrough
CT: control target
= control target key end

     0   :  { %s934_s24 = smov 0   ;;  %s1206_s0 = inlined_call_operand.vmem [shape: f32[2,8,256], index: 0, kind: input, shape index: {}]   ;;  %s1207_s1 = inlined_call_operand.vmem [shape: f32[8,72], index: 1, kind: input, shape index: {}]   ;;  %s1208_s2 = inlined_call_operand.vmem [shape: f32[8,8], index: 2, kind: input, shape index: {}]   ;;  %s1209_s3 = inlined_call_operand.vmem [shape: f32[256,64], index: 3, kind: input, shape index: {}]   ;;  %s1210_s4 = inlined_call_operand.vmem [shape: f32[2,8,64], index: 4, kind: output, shape index: {0}]   ;;  %s1211_s5 = inlined_call_operand.vmem [shape: f32[2,8,2], index: 5, kind: output, shape index: {1}]   ;;  %s1212_s6 = inlined_call_operand.vmem [shape: f32[2,8,64], index: 6, kind: output, shape index: {2}]   ;;  %s1213_s7 = inlined_call_operand.vmem [shape: f32[2,8,2], index: 7, kind: output, shape index: {3}]  }
   0x1 LB: > { %s829_s25 = sadd.s32 4294967295, %s884_s24   ;;  %p833_p0 = scmp.ge.s32.totalorder %s884_s24, 1  ;;  %s884_s24 = sphi %s934_s24, %s18_s24  }
   0x2   : > { %p244_p1 = scmp.lt.s32.totalorder %s884_s24, 3 }
   0x4   : > { %p245_p2 = pnand %p833_p0, %p244_p1 }
   0x5   : > { %p287_p3 = scmp.lt.s32.totalorder (!%p245_p2), %s829_s25, 1  ;;  %s886_s30 = smov (!%p245_p2), 112  }
   0x6   : > { %248 = sbr.rel (%p245_p2) target bundleno = 567 (0x237), region = 36  ;;  %s887_s8 = smov (!%p245_p2), 111  }
   0x7   : > { %s888_s9 = smov (!%p245_p2), 113   ;;  %s889_s10 = smov (!%p245_p2), 127  }
   0x8   : > { %s890_s11 = smov (!%p245_p2), 1   ;;  %s891_s12 = smov (!%p245_p2), 15  }
   0x9   : > { %s892_s13 = smov (!%p245_p2), 16   ;;  %s893_s14 = smov (!%p245_p2), 17  }
   0xb   : > { %s1223_s25 = smov (!%p287_p3, %s829_s25), 1  ;;  %v311_v2 = vlaneseq  ;;  %vm421_vm0 = vcmask 908288   ;;  %vm412_vm3 = vcmask 916480   ;;  %vm401_vm5 = vcmask 924672   ;;  %v556_v22 = vld [vmem:[%s1208_s2] sm:$0xff]  ;;  %v1000_v24 = vld [vmem:[%s1209_s3 + $0x78] sm:$0xff] }
   0xc   : > { %s861_s26 = sshll.u32 %s1223_s25, 4  ;;  %vm557_vm7 = vcmask 64512   ;;  %vm390_vm8 = vcmask 1039360   ;;  %v1005_v25 = vld [vmem:[%s1209_s3 + $0xf8] sm:$0xff]  ;;  %vm379_vm9 = vcmask 7168   ;;  %v1012_v28 = vld [vmem:[%s1209_s3 + $0x70] sm:$0xff] }
   0xd   : > { %s291_s29 = scalar_lea.vmem %s1206_s0, %s861_s26  ;;  %v312_v4 = vand.u32 127, %v311_v2  ;;  %v1017_v29 = vld [vmem:[%s1209_s3 + $0xf0] sm:$0xff]  ;;  %v1028_v32 = vld [vmem:[%s1209_s3 + $0x68] sm:$0xff]  ;;  %v1043_v35 = vld [vmem:[%s1209_s3 + $0x60] sm:$0xff]  ;;  %vm366_vm10 = vcmask 121856   ;;  %vm357_vm11 = vcmask 130048  }
   0xe   : > { %v948_v0 = vld [vmem:[%s291_s29] sm:$0xff]  ;;  %v952_v1 = vld [vmem:[%s291_s29 + $0x8] sm:$0xff]  ;;  %v1057_v38 = vld [vmem:[%s1209_s3 + $0x58] sm:$0xff]  ;;  %vm344_vm12 = vcmask 138240   ;;  %vm428_vm14 = vcmask 588800   ;;  %s1183_s20 = sshll.u32 %s1223_s25, 3 }
   0xf   : > { %408 = vrot.lane.b32.xlu1 %v948_v0, %s886_s30  ;;  %417 = vrot.lane.b32.xlu0 %v948_v0, %s887_s8  ;;  %v313_v5 = vadd.s32 128, %v312_v4  ;;  %v318_v9 = vand.u32 15, %v312_v4  ;;  %v1033_v33 = vld [vmem:[%s1209_s3 + $0xe8] sm:$0xff]  ;;  %v1048_v36 = vld [vmem:[%s1209_s3 + $0xe0] sm:$0xff]  ;;  %vm845_vm13 = vmneg %vm357_vm11  ;;  %s303_s23 = scalar_lea.vmem %s1212_s6, %s1183_s20  ;;  %vm544_vm15 = vcmask 523264   ;;  %s295_s25 = scalar_lea.vmem %s1210_s4, %s1183_s20 }
  0x10   : > { %397 = vrot.lane.b32.xlu2 %v948_v0, %s888_s9  ;;  %576 = vmatpush.msra.mxu0 %v948_v0  ;;  %v1062_v39 = vld [vmem:[%s1209_s3 + $0xd8] sm:$0xff]  ;;  %v1069_v42 = vld [vmem:[%s1209_s3 + $0x50] sm:$0xff]  ;;  %v1086_v47 = vld [vmem:[%s1209_s3 + $0x48] sm:$0xff] }
  0x11   : > { %596 = vmatpush.msra.mxu1 %v952_v1  ;;  %v325_v10 = vand.u32 15, %v313_v5  ;;  %vm970_vm1 = vcmp.le.s32.totalorder %v318_v9, 14  ;;  %vm982_vm4 = vcmp.ge.s32.totalorder %v318_v9, 1  ;;  %857 = vmatmul.msk.f32.vlgmr.msra.gmra.mxu0 %vm557_vm7, %v556_v22  ;;  %v1074_v43 = vld [vmem:[%s1209_s3 + $0xd0] sm:$0xff]  ;;  %v1091_v48 = vld [vmem:[%s1209_s3 + $0xc8] sm:$0xff]  ;;  %v480_v49 = vld [vmem:[%s1209_s3 + $0x40] sm:$0xff] }
  0x12   : > { %858 = vmatmul.msk.f32.vlgmr.msra.gmra.mxu1 %vm557_vm7, %v556_v22  ;;  %633 = vmatpush.msrb.mxu0 %v1000_v24  ;;  %v1103_v50 = vld [vmem:[%s1209_s3 + $0xc0] sm:$0xff]  ;;  %v479_v52 = vld [vmem:[%s1209_s3 + $0x38] sm:$0xff]  ;;  %v478_v57 = vld [vmem:[%s1209_s3 + $0x30] sm:$0xff] }
  0x13   : > { %vm974_vm2 = vcmp.le.s32.totalorder %v325_v10, 14  ;;  %vm986_vm6 = vcmp.ge.s32.totalorder %v325_v10, 1  ;;  %653 = vmatpush.msrb.mxu1 %v1005_v25  ;;  %v495_v53 = vld [vmem:[%s1209_s3 + $0xb8] sm:$0xff]  ;;  %v310_v59 = vld [vmem:[%s1207_s1] sm:$0xff]  ;;  %v494_v60 = vld [vmem:[%s1209_s3 + $0xb0] sm:$0xff] }
  0x14   : > { %634 = vmatpush.msrb.mxu0 %v1012_v28  ;;  %v477_v61 = vld [vmem:[%s1209_s3 + $0x28] sm:$0xff]  ;;  %v476_v63 = vld [vmem:[%s1209_s3 + $0x20] sm:$0xff]  ;;  %v491_v2 = vld [vmem:[%s1209_s3 + $0x98] sm:$0xff] }
  0x15   : > { %654 = vmatpush.msrb.mxu1 %v1017_v29  ;;  %v493_v62 = vld [vmem:[%s1209_s3 + $0xa8] sm:$0xff]  ;;  %v474_v4 = vld [vmem:[%s1209_s3 + $0x10] sm:$0xff]  ;;  %v472_v9 = vld [vmem:[%s1209_s3] sm:$0xff] }
  0x16   : > { %635 = vmatpush.msrb.mxu0 %v1028_v32  ;;  %v488_v10 = vld [vmem:[%s1209_s3 + $0x80] sm:$0xff] }
  0x17   : > { %410 = vrot.lane.b32.xlu1 %v952_v1, %s886_s30  ;;  %419 = vrot.lane.b32.xlu0 %v952_v1, %s887_s8  ;;  %s299_s30 = scalar_lea.vmem %s1211_s5, %s1183_s20 }
  0x18   : > { %399 = vrot.lane.b32.xlu2 %v952_v1, %s888_s9  ;;  %655 = vmatpush.msrb.mxu1 %v1033_v33 }
  0x19   : > { %636 = vmatpush.msrb.mxu0 %v1043_v35 }
  0x1a   : > { %656 = vmatpush.msrb.mxu1 %v1048_v36 }
  0x1b   : > { %637 = vmatpush.msrb.mxu0 %v1057_v38 }
  0x1c   : > { %657 = vmatpush.msrb.mxu1 %v1062_v39 }
  0x1d   : > { %638 = vmatpush.msrb.mxu0 %v1069_v42 }
  0x1e   : > { %658 = vmatpush.msrb.mxu1 %v1074_v43 }
  0x1f   : > { %388 = vrot.lane.b32.xlu1 %v952_v1, %s889_s10  ;;  %386 = vrot.lane.b32.xlu0 %v948_v0, %s889_s10  ;;  %s307_s10 = scalar_lea.vmem %s1213_s7, %s1183_s20 }
  0x20   : > { %375 = vrot.lane.b32.xlu2 %v948_v0, %s890_s11  ;;  %639 = vmatpush.msrb.mxu0 %v1086_v47 }
  0x21   : > { %659 = vmatpush.msrb.mxu1 %v1091_v48 }
  0x22   : > { %640 = vmatpush.msrb.mxu0 %v480_v49 }
  0x23   : > { %660 = vmatpush.msrb.mxu1 %v1103_v50 }
  0x24   : > { %641 = vmatpush.msrb.mxu0 %v479_v52 }
  0x25   : > { %661 = vmatpush.msrb.mxu1 %v495_v53 }
  0x26   : > { %642 = vmatpush.msrb.mxu0 %v478_v57 }
  0x27   : > { %362 = vrot.lane.b32.xlu1 %v948_v0, %s891_s12  ;;  %377 = vrot.lane.b32.xlu0 %v952_v1, %s890_s11 }
  0x28   : > { %364 = vrot.lane.b32.xlu2 %v952_v1, %s891_s12  ;;  %662 = vmatpush.msrb.mxu1 %v494_v60 }
  0x29   : > { %643 = vmatpush.msrb.mxu0 %v477_v61 }
  0x2a   : > { %663 = vmatpush.msrb.mxu1 %v493_v62 }
  0x2b   : > { %644 = vmatpush.msrb.mxu0 %v476_v63 }
  0x2f   : > { %355 = vrot.lane.b32.xlu1 %v952_v1, %s892_s13  ;;  %353 = vrot.lane.b32.xlu0 %v948_v0, %s892_s13 }
  0x30   : > { %340 = vrot.lane.b32.xlu2 %v948_v0, %s893_s14 }
  0x37   : > { %342 = vrot.lane.b32.xlu0 %v952_v1, %s893_s14 }
  0x6a   : > { %v398_v3 = vpop.permute.xlu2 %397 }
  0x72   : > { %v400_v8 = vpop.permute.xlu2 %399 }
  0x73   : > { %v405_v20 = vsel %vm401_vm5, %v400_v8, 0.0  ;;  %v402_v23 = vsel %vm401_vm5, %v398_v3, %v400_v8  ;;  %v489_v8 = vld [vmem:[%s1209_s3 + $0x88] sm:$0xff] }
  0x7a   : > { %v376_v21 = vpop.permute.xlu2 %375 }
  0x7b   : > { %v383_v34 = vsel %vm379_vm9, 0.0, %v376_v21 }
  0x81   : > { %v409_v6 = vpop.permute.xlu1 %408  ;;  %v418_v7 = vpop.permute.xlu0 %417 }
  0x82   : > { %v365_v37 = vpop.permute.xlu2 %364 }
  0x89   : > { %v411_v13 = vpop.permute.xlu1 %410  ;;  %v420_v14 = vpop.permute.xlu0 %419 }
  0x8a   : > { %v422_v15 = vsel %vm421_vm0, %v418_v7, %v420_v14  ;;  %v425_v16 = vsel %vm421_vm0, %v420_v14, 0.0  ;;  %v413_v18 = vsel %vm412_vm3, %v409_v6, %v411_v13  ;;  %v341_v51 = vpop.permute.xlu2 %340  ;;  %v490_v6 = vld [vmem:[%s1209_s3 + $0x90] sm:$0xff]  ;;  %v473_v7 = vld [vmem:[%s1209_s3 + $0x8] sm:$0xff]  ;;  %vm554_vm0 = vcmask 15360  }
  0x8b   : > { %840 = vmatpush.msk.msra.mxu2 %vm970_vm1, %v422_v15  ;;  %849 = vmatpush.msk.msra.mxu3 %vm974_vm2, %v425_v16  ;;  %v348_v56 = vsel %vm344_vm12, 0.0, %v341_v51 }
  0x8d   : > { %440 = vmatpush.msra.mxu2 %v413_v18  ;;  %850 = vmatpush.msk.msra.mxu3 %vm412_vm3, %v411_v13 }
  0x8e   : > { %v578_v11 = vpop.f32.mrf.mxu0 }
  0x8f   : > { %841 = vmatpush.msk.msra.mxu2 %vm982_vm4, %v402_v23  ;;  %851 = vmatpush.msk.msra.mxu3 %vm986_vm6, %v405_v20  ;;  %v598_v12 = vpop.f32.mrf.mxu1 }
  0x91   : > { %v389_v26 = vpop.permute.xlu1 %388  ;;  %v387_v27 = vpop.permute.xlu0 %386 }
  0x92   : > { %v391_v30 = vsel %vm390_vm8, %v387_v27, %v389_v26  ;;  %v394_v31 = vsel %vm390_vm8, %v389_v26, 0.0 }
  0x93   : > { %842 = vmatpush.msk.msra.mxu2 %vm970_vm1, %v391_v30  ;;  %852 = vmatpush.msk.msra.mxu3 %vm974_vm2, %v394_v31 }
  0x95   : > { %443 = vmatpush.msra.mxu2 %v948_v0  ;;  %463 = vmatpush.msra.mxu3 %v952_v1  ;;  %v492_v0 = vld [vmem:[%s1209_s3 + $0xa0] sm:$0xff]  ;;  %v475_v1 = vld [vmem:[%s1209_s3 + $0x18] sm:$0xff] }
  0x96   : > { %664 = vmatpush.msrb.mxu1 %v492_v0  ;;  %645 = vmatpush.msrb.mxu0 %v475_v1 }
  0x97   : > { %843 = vmatpush.msk.msra.mxu2 %vm982_vm4, %v383_v34 }
  0x98   : > { %665 = vmatpush.msrb.mxu1 %v491_v2  ;;  %646 = vmatpush.msrb.mxu0 %v474_v4 }
  0x99   : > { %v363_v40 = vpop.permute.xlu1 %362  ;;  %v378_v41 = vpop.permute.xlu0 %377 }
  0x9a   : > { %v380_v44 = vsel %vm379_vm9, %v376_v21, %v378_v41  ;;  %v370_v45 = vsel %vm366_vm10, 0.0, %v363_v40  ;;  %v367_v46 = vsel %vm366_vm10, %v363_v40, %v365_v37  ;;  %666 = vmatpush.msrb.mxu1 %v490_v6  ;;  %647 = vmatpush.msrb.mxu0 %v473_v7 }
  0x9b   : > { %853 = vmatpush.msk.msra.mxu3 %vm986_vm6, %v380_v44  ;;  %844 = vmatpush.msk.msra.mxu2 %vm970_vm1, %v370_v45 }
  0x9c   : > { %667 = vmatpush.msrb.mxu1 %v489_v8  ;;  %648 = vmatpush.msrb.mxu0 %v472_v9 }
  0x9d   : > { %854 = vmatpush.msk.msra.mxu3 %vm974_vm2, %v367_v46  ;;  %649 = vmatmul.f32.vlgmr.msrb.gmra.mxu0 %v578_v11 }
  0x9e   : > { %668 = vmatpush.msrb.mxu1 %v488_v10 }
  0x9f   : > { %669 = vmatmul.f32.vlgmr.msrb.gmra.mxu1 %v598_v12 }
  0xa1   : > { %v356_v54 = vpop.permute.xlu1 %355  ;;  %v354_v55 = vpop.permute.xlu0 %353 }
  0xa2   : > { %846 = vmatpush.msk.msra.mxu2 %vm845_vm13, %v354_v55  ;;  %v358_v58 = vsel %vm357_vm11, %v354_v55, %v356_v54 }
  0xa3   : > { %466 = vmatpush.msra.mxu3 %v358_v58 }
  0xa4   : > { %847 = vmatpush.msk.msra.mxu2 %vm982_vm4, %v348_v56 }
  0xa5   : > { %848 = vmatmul.msk.f32.vlgmr.msra.gmra.mxu2 %vm428_vm14, %v310_v59 }
  0xa6   : > { %504 = vmatpush.msrb.mxu2 %v1000_v24 }
  0xa8   : > { %505 = vmatpush.msrb.mxu2 %v1012_v28 }
  0xa9   : > { %v343_v3 = vpop.permute.xlu0 %342 }
  0xaa   : > { %v345_v5 = vsel %vm344_vm12, %v341_v51, %v343_v3  ;;  %506 = vmatpush.msrb.mxu2 %v1028_v32 }
  0xab   : > { %855 = vmatpush.msk.msra.mxu3 %vm986_vm6, %v345_v5 }
  0xac   : > { %856 = vmatmul.msk.f32.vlgmr.msra.gmra.mxu3 %vm428_vm14, %v310_v59  ;;  %507 = vmatpush.msrb.mxu2 %v1043_v35 }
  0xad   : > { %524 = vmatpush.msrb.mxu3 %v1005_v25 }
  0xae   : > { %508 = vmatpush.msrb.mxu2 %v1057_v38 }
  0xaf   : > { %525 = vmatpush.msrb.mxu3 %v1017_v29 }
  0xb0   : > { %509 = vmatpush.msrb.mxu2 %v1069_v42 }
  0xb1   : > { %526 = vmatpush.msrb.mxu3 %v1033_v33 }
  0xb2   : > { %510 = vmatpush.msrb.mxu2 %v1086_v47 }
  0xb3   : > { %527 = vmatpush.msrb.mxu3 %v1048_v36 }
  0xb4   : > { %511 = vmatpush.msrb.mxu2 %v480_v49 }
  0xb5   : > { %528 = vmatpush.msrb.mxu3 %v1062_v39 }
  0xb6   : > { %512 = vmatpush.msrb.mxu2 %v479_v52 }
  0xb7   : > { %529 = vmatpush.msrb.mxu3 %v1074_v43 }
  0xb8   : > { %513 = vmatpush.msrb.mxu2 %v478_v57 }
  0xb9   : > { %530 = vmatpush.msrb.mxu3 %v1091_v48 }
  0xba   : > { %514 = vmatpush.msrb.mxu2 %v477_v61 }
  0xbb   : > { %531 = vmatpush.msrb.mxu3 %v1103_v50 }
  0xbc   : > { %515 = vmatpush.msrb.mxu2 %v476_v63 }
  0xbd   : > { %532 = vmatpush.msrb.mxu3 %v495_v53 }
  0xbe   : > { %516 = vmatpush.msrb.mxu2 %v475_v1 }
  0xbf   : > { %533 = vmatpush.msrb.mxu3 %v494_v60 }
  0xc0   : > { %517 = vmatpush.msrb.mxu2 %v474_v4 }
  0xc1   : > { %534 = vmatpush.msrb.mxu3 %v493_v62 }
  0xc2   : > { %518 = vmatpush.msrb.mxu2 %v473_v7 }
  0xc3   : > { %535 = vmatpush.msrb.mxu3 %v492_v0 }
  0xc4   : > { %519 = vmatpush.msrb.mxu2 %v472_v9 }
  0xc5   : > { %536 = vmatpush.msrb.mxu3 %v491_v2 }
  0xc7   : > { %537 = vmatpush.msrb.mxu3 %v490_v6 }
  0xc9   : > { %538 = vmatpush.msrb.mxu3 %v489_v8 }
  0xcb   : > { %539 = vmatpush.msrb.mxu3 %v488_v10 }
 0x11a   : > { %v650_v15 = vpop.f32.mrf.mxu0 }
 0x11c   : > { %v670_v16 = vpop.f32.mrf.mxu1 }
 0x11d   : > { %v671_v17 = vadd.f32 %v670_v16, %v650_v15 }
 0x11f   : > { %673 = vst.msk [vmem:[%s303_s23] sm:$0xff] %vm544_vm15, %v671_v17  ;;  %v674_v18 = vsel %vm544_vm15, %v671_v17, 0.0  ;;  %v677_v25 = vmul.f32 %v671_v17, %v671_v17 }
 0x120   : > { %675 = vadd.xlane.f32.xlu0 %v674_v18 }
 0x121   : > { %v678_v26 = vsel %vm544_vm15, %v677_v25, 0.0 }
 0x128   : > { %v449_v13 = vpop.f32.mrf.mxu2 }
 0x129   : > { %520 = vmatmul.f32.vlgmr.msrb.gmra.mxu2 %v449_v13 }
 0x12f   : > { %v469_v14 = vpop.f32.mrf.mxu3 }
 0x130   : > { %540 = vmatmul.f32.vlgmr.msrb.gmra.mxu3 %v469_v14 }
 0x193   : > { %v676_v30 = vpop.xlane.xlu0 %675 }
 0x1ac   : > { %v521_v19 = vpop.f32.mrf.mxu2 }
 0x1b3   : > { %v541_v20 = vpop.f32.mrf.mxu3 }
 0x1b4   : > { %v542_v21 = vadd.f32 %v541_v20, %v521_v19 }
 0x1b6   : > { %545 = vst.msk [vmem:[%s295_s25] sm:$0xff] %vm544_vm15, %v542_v21  ;;  %v546_v22 = vsel %vm544_vm15, %v542_v21, 0.0  ;;  %v549_v23 = vmul.f32 %v542_v21, %v542_v21 }
 0x1b7   : > { %547 = vadd.xlane.f32.xlu1 %v546_v22 }
 0x1b8   : > { %v550_v24 = vsel %vm544_vm15, %v549_v23, 0.0 }
 0x1b9   : > { %551 = vadd.xlane.f32.xlu2 %v550_v24 }
 0x1c1   : > { %679 = vadd.xlane.f32.xlu2 %v678_v26 }
 0x22a   : > { %v548_v27 = vpop.xlane.xlu1 %547 }
 0x22c   : > { %v552_v28 = vpop.xlane.xlu2 %551 }
 0x22d   : > { %v553_v29 = vsel %vm379_vm9, %v548_v27, %v552_v28 }
 0x22e   : > { %555 = vst.msk [vmem:[%s299_s30] sm:$0xff] %vm554_vm0, %v553_v29 }
 0x234   : > { %v680_v31 = vpop.xlane.xlu2 %679 }
 0x235   : > { %v681_v32 = vsel %vm379_vm9, %v676_v30, %v680_v31 }
 0x236   : > { %682 = vst.msk [vmem:[%s307_s10] sm:$0xff] %vm554_vm0, %v681_v32 }
 0x237 PF: > { %s18_s24 = sadd.s32 1, %s884_s24  }
 0x238   : > { %p15_p4 = scmp.ge.s32.totalorder %s18_s24, 4  }
 0x23a   :  { %17 = sbr.rel (!%p15_p4) target bundleno = 1 (0x1), region = 102 }

</bundles_post_ra>
